<compile_context>
chip_gen: v7x
topology: tpu7x:2x2x1
jax: 0.10.0
libtpu: 0.0.40
codegen_flags: <defaults>
</compile_context>

<pallas_src>
import functools

import jax
import jax.numpy as jnp
from jax.experimental import pallas as pl
from jax.experimental.pallas import tpu as pltpu

EPS = 1e-5  # torch.nn.LayerNorm default


def _round_up(x, m):
    return ((x + m - 1) // m) * m


def _make_kernel(mm_dtype, use_highest_precision):
    prec = jax.lax.Precision.HIGHEST if use_highest_precision else None

    def kernel(x_ref, w_ref, b_ref, o_ref):
        # x_ref: (tm, D) activation tile
        # w_ref: (D, tn) folded weight tile (gamma absorbed), resident
        # b_ref: (1, tn) folded bias tile (beta@W + bias), f32, resident
        # o_ref: (tm, tn) output tile
        xf = x_ref[...].astype(jnp.float32)
        inv_d = jnp.float32(1.0 / x_ref.shape[-1])

        # Single-pass LayerNorm statistics (biased variance, like torch).
        mean = jnp.sum(xf, axis=-1, keepdims=True) * inv_d
        mean_sq = jnp.sum(xf * xf, axis=-1, keepdims=True) * inv_d
        var = mean_sq - mean * mean
        rstd = jax.lax.rsqrt(var + EPS)
        xn = xf * rstd - mean * rstd          # no separate `centered` temp

        out = jnp.dot(xn.astype(mm_dtype), w_ref[...],
                      preferred_element_type=jnp.float32, precision=prec)
        o_ref[...] = (out + b_ref[...]).astype(o_ref.dtype)

    return kernel


def cls_layer_txt_forward(lang_feat, img_feat, gamma, beta, w, bias, *, tm=512):
    """Fused LayerNorm + Linear. img_feat is ignored (as in the reference)."""
    del img_feat
    B, S, D = lang_feat.shape
    Din, O = w.shape
    assert Din == D
    rows = B * S
    x2d = lang_feat.reshape(rows, D)
    act_dtype = lang_feat.dtype
    act_bpe = jnp.dtype(act_dtype).itemsize

    # ---- Per-generation VMEM budgets ----
    vmem_bytes = 64 * 1024 * 1024  # conservative default (v7x per-TC VMEM)
    try:
        info = pltpu.get_tpu_info()
        vmem_bytes = int(getattr(info, "vmem_capacity_bytes", vmem_bytes))
    except Exception:
        pass
    # ~28 MiB tile budget on v7x (64 MiB VMEM), ~56 MiB on v5e/v6e (128 MiB).
    budget = max(8 << 20, min(vmem_bytes // 2 - (4 << 20), 56 << 20))

    # ---- MXU operand dtype ----
    # bf16 operands (f32 accumulation) only when the weight is big enough for
    # the matmul / resident-weight footprint to matter; otherwise keep the
    # activation dtype and ask for HIGHEST precision (kernel is HBM-bound).
    if jnp.dtype(act_dtype) == jnp.dtype(jnp.float32) and (
            D >= 1024 or D * max(O, 128) * 4 >= (4 << 20)):
        mm_dtype = jnp.bfloat16
    else:
        mm_dtype = act_dtype
    mm_bpe = jnp.dtype(mm_dtype).itemsize
    use_highest = jnp.dtype(mm_dtype) == jnp.dtype(jnp.float32)

    # ---- One-time parameter preprocessing (outside the kernel) ----
    # Fold the LayerNorm affine into the projection:
    #   (xn*g + b) @ W + bias == xn @ (g[:,None]*W) + (b @ W + bias)
    w_f32 = w.astype(jnp.float32)
    w_fold = gamma.astype(jnp.float32)[:, None] * w_f32
    bias_fold = beta.astype(jnp.float32) @ w_f32 + bias.astype(jnp.float32)

    # ---- Output-column padding / tiling ----
    # O <= 128: keep the native width (masked stores beat 8x write padding).
    # O  > 128: pad to a 128 multiple (lane-dense stores) and, if the resident
    #           weight would be too large, tile the output columns.
    if O <= 128:
        tn = O
        O_pad = O
    else:
        max_w_bytes = min(budget // 3, 16 << 20)   # resident weight budget
        tn_cap = max(128, (max_w_bytes // max(1, D * mm_bpe)) // 128 * 128)
        tn = min(_round_up(O, 128), tn_cap)
        O_pad = _round_up(O, tn)
    n_tiles = max(1, O_pad // tn)

    if O_pad != O:
        w_fold = jnp.pad(w_fold, ((0, 0), (0, O_pad - O)))
        bias_fold = jnp.pad(bias_fold, (0, O_pad - O))
    w_fold = w_fold.astype(mm_dtype)
    bias2d = bias_fold.reshape(1, O_pad).astype(jnp.float32)

    # ---- Row-tile selection (VMEM footprint incl. in-kernel f32 temps) ----
    out_bpe = act_bpe

    def footprint(t, w_bufs):
        act_in = 2 * t * D * act_bpe                 # double-buffered input
        out = 2 * t * tn * out_bpe                   # double-buffered output
        wgt = w_bufs * D * tn * mm_bpe               # resident weight tile(s)
        bia = w_bufs * tn * 4
        # in-kernel temporaries: x_f32, xn (f32), MXU-cast copy, f32 dot acc
        tmp = 3 * t * D * 4 + t * D * mm_bpe + t * tn * 4
        return act_in + out + wgt + bia + tmp

    tm = max(8, _round_up(min(int(tm), rows), 8))
    # Keep >=2 grid steps along rows (>=4 when enough rows) so DMA pipelining
    # works and both v7x TensorCores get a share of the parallel row axis.
    if rows > 8:
        steps = 4 if rows >= 32 else 2
        tm = min(tm, _round_up(pl.cdiv(rows, steps), 8))
    # Budget with w_bufs=2 so the double-buffered fallback still fits.
    while tm > 8 and footprint(tm, 2) > budget:
        tm -= 8

    m_tiles = pl.cdiv(rows, tm)
    grid = (n_tiles, m_tiles)  # n outer -> weight tile resident across rows

    headroom = 8 << 20
    vmem_limit = int(min(footprint(tm, 2) + headroom,
                         vmem_bytes - (12 << 20),
                         100 << 20))
    vmem_limit = max(vmem_limit, 16 << 20)

    kernel = _make_kernel(mm_dtype, use_highest)
    out_shape = jax.ShapeDtypeStruct((rows, O_pad), act_dtype)
    x_spec = pl.BlockSpec((tm, D), lambda j, i: (i, 0))
    o_spec = pl.BlockSpec((tm, tn), lambda j, i: (i, j))

    def run(single_buffer_consts):
        if single_buffer_consts:
            w_spec = pl.BlockSpec((D, tn), lambda j, i: (0, j),
                                  pipeline_mode=pl.Buffered(1))
            b_spec = pl.BlockSpec((1, tn), lambda j, i: (0, j),
                                  pipeline_mode=pl.Buffered(1))
        else:
            w_spec = pl.BlockSpec((D, tn), lambda j, i: (0, j))
            b_spec = pl.BlockSpec((1, tn), lambda j, i: (0, j))
        return pl.pallas_call(
            kernel,
            out_shape=out_shape,
            grid_spec=pltpu.PrefetchScalarGridSpec(
                num_scalar_prefetch=0,
                grid=grid,
                in_specs=[x_spec, w_spec, b_spec],
                out_specs=o_spec,
            ),
            compiler_params=pltpu.CompilerParams(
                dimension_semantics=("parallel", "parallel"),
                vmem_limit_bytes=vmem_limit),
        )(x2d, w_fold, bias2d)

    try:
        out2d = run(True)
    except Exception:
        # This JAX build rejects single-buffered BlockSpecs; fall back to the
        # default double-buffered constants (footprint already budgets 2x).
        out2d = run(False)

    if O_pad != O:
        out2d = out2d[:, :O]
    return out2d.reshape(B, S, O)


if __name__ == "__main__":
    # Small shapes consistent with the module: (batch, seq, input_dim) text feats.
    B, S, D, O = 2, 8, 32, 16

    key = jax.random.PRNGKey(0)
    k_lang, k_img, k_w, k_b = jax.random.split(key, 4)

    lang_feat = jax.random.normal(k_lang, (B, S, D), dtype=jnp.float32)
    img_feat = jax.random.normal(k_img, (B, S, D), dtype=jnp.float32)  # unused

    # Deterministic parameter init (synthetic, not a checkpoint).
    gamma = jnp.ones((D,), dtype=jnp.float32)          # LayerNorm weight
    beta = jnp.zeros((D,), dtype=jnp.float32)          # LayerNorm bias
    w = jax.random.normal(k_w, (D, O), dtype=jnp.float32) * (1.0 / jnp.sqrt(D))
    bias = jax.random.normal(k_b, (O,), dtype=jnp.float32) * 0.01

    out = cls_layer_txt_forward(lang_feat, img_feat, gamma, beta, w, bias)
    out = jax.block_until_ready(out)

    # Cross-check against plain JAX reference.
    mean = jnp.mean(lang_feat, axis=-1, keepdims=True)
    var = jnp.mean((lang_feat - mean) ** 2, axis=-1, keepdims=True)
    xn = (lang_feat - mean) / jnp.sqrt(var + EPS)
    ref = (xn * gamma + beta) @ w + bias
    assert out.shape == (B, S, O)
    assert jnp.allclose(out, ref, atol=1e-4, rtol=1e-4)

    print("KERNEL_OK")
</pallas_src>

<mosaic_0001>
module attributes {stable_mosaic.version = 11 : i64} {
  func.func @kernel(%arg0: i32, %arg1: i32, %arg2: memref<8x32xf32, #tpu.memory_space<vmem>>, %arg3: memref<32x16xf32, #tpu.memory_space<vmem>>, %arg4: memref<1x16xf32, #tpu.memory_space<vmem>>, %arg5: memref<8x16xf32, #tpu.memory_space<vmem>>) attributes {dimension_semantics = [#tpu.dimension_semantics<parallel>, #tpu.dimension_semantics<parallel>], iteration_bounds = array<i64: 1, 2>, scalar_prefetch = 0 : i64, scratch_operands = 0 : i64, tpu.core_type = #tpu.core_type<tc>, window_params = [{transform_indices = @transform_0, window_bounds = array<i64: 8, 32>}, {pipeline_mode = #tpu.pipeline_mode<synchronous>, transform_indices = @transform_1, window_bounds = array<i64: 32, 16>}, {pipeline_mode = #tpu.pipeline_mode<synchronous>, transform_indices = @transform_2, window_bounds = array<i64: 1, 16>}, {transform_indices = @transform_3, window_bounds = array<i64: 8, 16>}]} {
    %c0 = arith.constant 0 : index
    %c0_0 = arith.constant 0 : index
    %0 = vector.load %arg2[%c0, %c0_0] : memref<8x32xf32, #tpu.memory_space<vmem>>, vector<8x32xf32>
    %cst = arith.constant dense<0.000000e+00> : vector<8xf32>
    %1 = vector.multi_reduction <add>, %0, %cst [1] : vector<8x32xf32> to vector<8xf32>
    %2 = vector.shape_cast %1 : vector<8xf32> to vector<8x1xf32>
    %cst_1 = arith.constant 3.125000e-02 : f32
    %3 = vector.broadcast %cst_1 : f32 to vector<8x1xf32>
    %4 = arith.mulf %2, %3 : vector<8x1xf32>
    %5 = arith.mulf %0, %0 : vector<8x32xf32>
    %cst_2 = arith.constant dense<0.000000e+00> : vector<8xf32>
    %6 = vector.multi_reduction <add>, %5, %cst_2 [1] : vector<8x32xf32> to vector<8xf32>
    %7 = vector.shape_cast %6 : vector<8xf32> to vector<8x1xf32>
    %cst_3 = arith.constant 3.125000e-02 : f32
    %8 = vector.broadcast %cst_3 : f32 to vector<8x1xf32>
    %9 = arith.mulf %7, %8 : vector<8x1xf32>
    %10 = arith.mulf %4, %4 : vector<8x1xf32>
    %11 = arith.subf %9, %10 : vector<8x1xf32>
    %cst_4 = arith.constant 9.99999974E-6 : f32
    %12 = vector.broadcast %cst_4 : f32 to vector<8x1xf32>
    %13 = arith.addf %11, %12 : vector<8x1xf32>
    %14 = math.rsqrt %13 : vector<8x1xf32>
    %15 = vector.broadcast %14 : vector<8x1xf32> to vector<8x32xf32>
    %16 = arith.mulf %0, %15 : vector<8x32xf32>
    %17 = arith.mulf %4, %14 : vector<8x1xf32>
    %18 = vector.broadcast %17 : vector<8x1xf32> to vector<8x32xf32>
    %19 = arith.subf %16, %18 : vector<8x32xf32>
    %c0_5 = arith.constant 0 : index
    %c0_6 = arith.constant 0 : index
    %20 = vector.load %arg3[%c0_5, %c0_6] : memref<32x16xf32, #tpu.memory_space<vmem>>, vector<32x16xf32>
    %cst_7 = arith.constant dense<0.000000e+00> : vector<8x16xf32>
    %21 = tpu.matmul %19, %20, %cst_7 {dimension_numbers = #tpu.dot_dimension_numbers<[1], [0], [0], [1], [0, 0, 1, 1], [], []>, precision = #tpu.contract_precision<fp32>} : vector<8x32xf32>, vector<32x16xf32>, vector<8x16xf32> -> vector<8x16xf32>
    %c0_8 = arith.constant 0 : index
    %c0_9 = arith.constant 0 : index
    %22 = vector.load %arg4[%c0_8, %c0_9] : memref<1x16xf32, #tpu.memory_space<vmem>>, vector<1x16xf32>
    %23 = vector.broadcast %22 : vector<1x16xf32> to vector<8x16xf32>
    %24 = arith.addf %21, %23 : vector<8x16xf32>
    %c0_10 = arith.constant 0 : index
    %c0_11 = arith.constant 0 : index
    %25 = vector.load %arg5[%c0_10, %c0_11] : memref<8x16xf32, #tpu.memory_space<vmem>>, vector<8x16xf32>
    tpu.vector_store %arg5[%c0_10, %c0_11], %24 {strides = array<i32>} : memref<8x16xf32, #tpu.memory_space<vmem>>, vector<8x16xf32>,
    return
  }
  func.func @transform_0(%arg0: i32, %arg1: i32) -> (i32, i32) {
    %c0_i32 = arith.constant 0 : i32
    %c0_i32_0 = arith.constant 0 : i32
    return %arg1, %c0_i32 : i32, i32
  }
  func.func @transform_1(%arg0: i32, %arg1: i32) -> (i32, i32) {
    %c0_i32 = arith.constant 0 : i32
    %c0_i32_0 = arith.constant 0 : i32
    return %c0_i32, %arg0 : i32, i32
  }
  func.func @transform_2(%arg0: i32, %arg1: i32) -> (i32, i32) {
    %c0_i32 = arith.constant 0 : i32
    %c0_i32_0 = arith.constant 0 : i32
    return %c0_i32, %arg0 : i32, i32
  }
  func.func @transform_3(%arg0: i32, %arg1: i32) -> (i32, i32) {
    %c0_i32 = arith.constant 0 : i32
    return %arg1, %arg0 : i32, i32
  }
}

module attributes {stable_mosaic.version = 11 : i64} {
  func.func @kernel(%arg0: i32, %arg1: i32, %arg2: memref<8x32xf32, #tpu.memory_space<vmem>>, %arg3: memref<32x16xf32, #tpu.memory_space<vmem>>, %arg4: memref<1x16xf32, #tpu.memory_space<vmem>>, %arg5: memref<8x16xf32, #tpu.memory_space<vmem>>) attributes {dimension_semantics = [#tpu.dimension_semantics<parallel>, #tpu.dimension_semantics<parallel>], iteration_bounds = array<i64: 1, 2>, scalar_prefetch = 0 : i64, scratch_operands = 0 : i64, tpu.core_type = #tpu.core_type<tc>, window_params = [{transform_indices = @transform_0, window_bounds = array<i64: 8, 32>}, {transform_indices = @transform_1, window_bounds = array<i64: 32, 16>}, {transform_indices = @transform_2, window_bounds = array<i64: 1, 16>}, {transform_indices = @transform_3, window_bounds = array<i64: 8, 16>}]} {
    %c0 = arith.constant 0 : index
    %c0_0 = arith.constant 0 : index
    %0 = vector.load %arg2[%c0, %c0_0] : memref<8x32xf32, #tpu.memory_space<vmem>>, vector<8x32xf32>
    %cst = arith.constant dense<0.000000e+00> : vector<8xf32>
    %1 = vector.multi_reduction <add>, %0, %cst [1] : vector<8x32xf32> to vector<8xf32>
    %2 = vector.shape_cast %1 : vector<8xf32> to vector<8x1xf32>
    %cst_1 = arith.constant 3.125000e-02 : f32
    %3 = vector.broadcast %cst_1 : f32 to vector<8x1xf32>
    %4 = arith.mulf %2, %3 : vector<8x1xf32>
    %5 = arith.mulf %0, %0 : vector<8x32xf32>
    %cst_2 = arith.constant dense<0.000000e+00> : vector<8xf32>
    %6 = vector.multi_reduction <add>, %5, %cst_2 [1] : vector<8x32xf32> to vector<8xf32>
    %7 = vector.shape_cast %6 : vector<8xf32> to vector<8x1xf32>
    %cst_3 = arith.constant 3.125000e-02 : f32
    %8 = vector.broadcast %cst_3 : f32 to vector<8x1xf32>
    %9 = arith.mulf %7, %8 : vector<8x1xf32>
    %10 = arith.mulf %4, %4 : vector<8x1xf32>
    %11 = arith.subf %9, %10 : vector<8x1xf32>
    %cst_4 = arith.constant 9.99999974E-6 : f32
    %12 = vector.broadcast %cst_4 : f32 to vector<8x1xf32>
    %13 = arith.addf %11, %12 : vector<8x1xf32>
    %14 = math.rsqrt %13 : vector<8x1xf32>
    %15 = vector.broadcast %14 : vector<8x1xf32> to vector<8x32xf32>
    %16 = arith.mulf %0, %15 : vector<8x32xf32>
    %17 = arith.mulf %4, %14 : vector<8x1xf32>
    %18 = vector.broadcast %17 : vector<8x1xf32> to vector<8x32xf32>
    %19 = arith.subf %16, %18 : vector<8x32xf32>
    %c0_5 = arith.constant 0 : index
    %c0_6 = arith.constant 0 : index
    %20 = vector.load %arg3[%c0_5, %c0_6] : memref<32x16xf32, #tpu.memory_space<vmem>>, vector<32x16xf32>
    %cst_7 = arith.constant dense<0.000000e+00> : vector<8x16xf32>
    %21 = tpu.matmul %19, %20, %cst_7 {dimension_numbers = #tpu.dot_dimension_numbers<[1], [0], [0], [1], [0, 0, 1, 1], [], []>, precision = #tpu.contract_precision<fp32>} : vector<8x32xf32>, vector<32x16xf32>, vector<8x16xf32> -> vector<8x16xf32>
    %c0_8 = arith.constant 0 : index
    %c0_9 = arith.constant 0 : index
    %22 = vector.load %arg4[%c0_8, %c0_9] : memref<1x16xf32, #tpu.memory_space<vmem>>, vector<1x16xf32>
    %23 = vector.broadcast %22 : vector<1x16xf32> to vector<8x16xf32>
    %24 = arith.addf %21, %23 : vector<8x16xf32>
    %c0_10 = arith.constant 0 : index
    %c0_11 = arith.constant 0 : index
    %25 = vector.load %arg5[%c0_10, %c0_11] : memref<8x16xf32, #tpu.memory_space<vmem>>, vector<8x16xf32>
    tpu.vector_store %arg5[%c0_10, %c0_11], %24 {strides = array<i32>} : memref<8x16xf32, #tpu.memory_space<vmem>>, vector<8x16xf32>,
    return
  }
  func.func @transform_0(%arg0: i32, %arg1: i32) -> (i32, i32) {
    %c0_i32 = arith.constant 0 : i32
    %c0_i32_0 = arith.constant 0 : i32
    return %arg1, %c0_i32 : i32, i32
  }
  func.func @transform_1(%arg0: i32, %arg1: i32) -> (i32, i32) {
    %c0_i32 = arith.constant 0 : i32
    %c0_i32_0 = arith.constant 0 : i32
    return %c0_i32, %arg0 : i32, i32
  }
  func.func @transform_2(%arg0: i32, %arg1: i32) -> (i32, i32) {
    %c0_i32 = arith.constant 0 : i32
    %c0_i32_0 = arith.constant 0 : i32
    return %c0_i32, %arg0 : i32, i32
  }
  func.func @transform_3(%arg0: i32, %arg1: i32) -> (i32, i32) {
    %c0_i32 = arith.constant 0 : i32
    return %arg1, %arg0 : i32, i32
  }
}

</mosaic_0001>

<bundles_post_ra>
// kernel: tpu_custom_call.1
= control target key start
LH: loop header
LB: loop body
LE: loop exit
PB: predicated region body
PF: predicated region fallthrough
CT: control target
= control target key end

     0   :  { %8 = vsyncpa [#allocation3], 0  ;;  %s1334_s0 = inlined_call_operand.vmem [shape: f32[16,32], index: 0, kind: input, shape index: {}]   ;;  %s1335_s1 = inlined_call_operand.vmem [shape: f32[32,16], index: 1, kind: input, shape index: {}]   ;;  %s1336_s2 = inlined_call_operand.vmem [shape: f32[1,16], index: 2, kind: input, shape index: {}]   ;;  %s1337_s3 = inlined_call_operand.hbm [shape: f32[16,16], index: 3, kind: output, shape index: {}]  }
   0x1   :  { %10 = vsyncpa [#allocation3 + $0x1], 0  ;;  %s1160_s12 = smov 0   ;;  %s1162_s13 = smov 0  }
   0x2   :  { %s1164_s14 = smov 0   ;;  %s1166_s15 = smov 0  }
   0x3   :  { %s1168_s16 = smov 0   ;;  %s1170_s17 = smov 0  }
   0x4 LB: > { %s840_s18 = sadd.s32 4294967295, %s1134_s17   ;;  %s841_s19 = sadd.s32 4294967294, %s1134_s17   ;;  %s1134_s17 = sphi %s1170_s17, %s16_s17   ;;  %s1130_s16 = sphi %s1168_s16, %s1344_s16   ;;  %s1126_s15 = sphi %s1166_s15, %s1343_s15   ;;  %s1122_s14 = sphi %s1164_s14, %s1342_s14   ;;  %s1118_s13 = sphi %s1162_s13, %s1341_s13   ;;  %s1114_s12 = sphi %s1160_s12, %s1340_s12  }
   0x5   : > { %s25_s20 = sadd.s32 1, %s1130_s16  ;;  %s115_s21 = sadd.s32 1, %s1122_s14 }
   0x6   : > { %p26_p0 = scmp.ge.s32.totalorder %s25_s20, 2  ;;  %p125_p1 = scmp.ne.s32.totalorder %s1122_s14, %s1118_s13 }
   0x7   : > { %p126_p2 = scmp.eq.s32.totalorder %s840_s18, 1  ;;  %p131_p3 = scmp.ne.s32.totalorder %s1118_s13, %s1114_s12 }
   0x8   : > { %s1346_s20 = smov (%p26_p0, %s25_s20), 0  ;;  %p132_p5 = scmp.eq.s32.totalorder %s841_s19, 1 }
   0x9   : > { %p1200_p4 = por %p126_p2, %p125_p1  ;;  %s110_s23 = ssub.s32 %s1130_s16, %s1346_s20 }
   0xa   : > { %p846_p6 = scmp.ge.s32.totalorder %s1134_s17, 1  ;;  %p113_p7 = scmp.eq.s32.totalorder %s110_s23, 0 }
   0xb   : > { %p1207_p8 = por %p132_p5, %p131_p3  ;;  %p170_p9 = scmp.lt.s32.totalorder %s1134_s17, 3 }
   0xc   : > { %s1213_s25 = scalar_select %p113_p7, %s1122_s14, %s115_s21  }
   0xd   : > { %p171_p10 = pnand %p846_p6, %p170_p9 }
   0xe   : > { %p200_p11 = scmp.lt.s32.totalorder (!%p171_p10), %s1126_s15, 1  ;;  %vm212_vm0 = vcmask (!%p171_p10), 261120   ;;  %v229_v4 = vld [vmem:[%s1335_s1] sm:$0xff] (!%p171_p10)  ;;  %v230_v5 = vld [vmem:[%s1335_s1 + $0x8] sm:$0xff] (!%p171_p10)  ;;  %v231_v6 = vld [vmem:[%s1335_s1 + $0x10] sm:$0xff] (!%p171_p10)  ;;  %v1136_v7 = vmov (!%p171_p10), 0.0|0.0  }
   0xf   : > { %174 = sbr.rel (%p171_p10) target bundleno = 452 (0x1c4), region = 32  ;;  %968 = vmatprep.subr.bf16.mxu0 (!%p171_p10), %v1136_v7  ;;  %v244_v8 = vand.u32 (!%p171_p10), 4294901760, %v229_v4  ;;  %v247_v9 = vand.u32 (!%p171_p10), 4294901760, %v230_v5  ;;  %950 = vmatprep.subr.bf16.mxu1 (!%p171_p10), %v1136_v7  ;;  %v232_v10 = vld [vmem:[%s1335_s1 + $0x18] sm:$0xff] (!%p171_p10)  ;;  %v250_v11 = vand.u32 (!%p171_p10), 4294901760, %v231_v6  ;;  %vm1137_vm1 = vmmov (!%p171_p10), 0  }
  0x10   : > { %v253_v12 = vand.u32 (!%p171_p10), 4294901760, %v232_v10  ;;  %v1138_v13 = vmov (!%p171_p10), 0.0   ;;  %s197_s18 = sand.u32 (!%p171_p10), 1, %s1118_s13   ;;  %v849_v57 = vld [vmem:[%s1336_s2] ss:$0 sm:$0xff] (!%p171_p10)  ;;  %vm728_vm2 = vcmask (!%p171_p10), 130048  }
  0x11   : > { %925 = vmatprep.mubr.msk.f32.mxu0 (!%p171_p10), %vm1137_vm1, %v1138_v13  ;;  %892 = vmatprep.mubr.msk.f32.mxu1 (!%p171_p10), %vm1137_vm1, %v1138_v13  ;;  %v951_v14 = vpack.c.bf16 (!%p171_p10), %v247_v9, %v244_v8  ;;  %v1240_v15 = vsub.f32 (!%p171_p10), %v229_v4, %v244_v8  ;;  %v1242_v16 = vsub.f32 (!%p171_p10), %v230_v5, %v247_v9  ;;  %s847_s19 = sshll.u32 (!%p171_p10), %s197_s18, 3  ;;  %s731_s5 = scalar_lea.sflag (!%p171_p10), [#allocation3], %s197_s18 }
  0x12   : > { %v1244_v17 = vsub.f32 (!%p171_p10), %v231_v6, %v250_v11  ;;  %v1246_v18 = vsub.f32 (!%p171_p10), %v232_v10, %v253_v12  ;;  %v954_v19 = vpack.c.bf16 (!%p171_p10), %v253_v12, %v250_v11 }
  0x13   : > { %970 = vmatpush3.bf16.msra.mxu0 (!%p171_p10), %v951_v14  ;;  %952 = vmatpush3.bf16.msra.mxu1 (!%p171_p10), %v951_v14  ;;  %v325_v20 = vand.u32 (!%p171_p10), 4294901760, %v1240_v15  ;;  %v332_v21 = vand.u32 (!%p171_p10), 4294901760, %v1242_v16  ;;  %v963_v36 = vpack.c.bf16 (!%p171_p10), %v1242_v16, %v1240_v15 }
  0x14   : > { %971 = vmatprep.subr.bf16.mxu0 (!%p171_p10), %v1136_v7  ;;  %953 = vmatprep.subr.bf16.mxu1 (!%p171_p10), %v1136_v7  ;;  %v339_v27 = vand.u32 (!%p171_p10), 4294901760, %v1244_v17  ;;  %v346_v28 = vand.u32 (!%p171_p10), 4294901760, %v1246_v18  ;;  %v966_v37 = vpack.c.bf16 (!%p171_p10), %v1246_v18, %v1244_v17 }
  0x15   : > { %v975_v22 = vpack.c.bf16 (!%p171_p10), %v332_v21, %v325_v20  ;;  %v326_v23 = vsub.f32 (!%p171_p10), %v1240_v15, %v325_v20  ;;  %v333_v24 = vsub.f32 (!%p171_p10), %v1242_v16, %v332_v21 }
  0x16   : > { %s201_s26 = scalar_select %p200_p11, %s1126_s15, 1  ;;  %v978_v30 = vpack.c.bf16 %v346_v28, %v339_v27  ;;  %v340_v31 = vsub.f32 %v1244_v17, %v339_v27  ;;  %v347_v32 = vsub.f32 %v1246_v18, %v346_v28 }
  0x17   : > { %973 = vmatpush3.bf16.msra.mxu0 %v954_v19  ;;  %955 = vmatpush3.bf16.msra.mxu1 %v954_v19  ;;  %v327_v25 = vand.u32 4294901760, %v326_v23  ;;  %v334_v26 = vand.u32 4294901760, %v333_v24 }
  0x18   : > { %s848_s27 = sshll.u32 %s201_s26, 3  ;;  %974 = vmatprep.subr.bf16.mxu0 %v1136_v7  ;;  %956 = vmatprep.subr.bf16.mxu1 %v1136_v7  ;;  %v341_v33 = vand.u32 4294901760, %v340_v31  ;;  %v348_v34 = vand.u32 4294901760, %v347_v32  ;;  %s851_s26 = sshll.u32 %s1126_s15, 7 }
  0x19   : > { %s203_s30 = scalar_lea.vmem %s1334_s0, %s848_s27  ;;  %v957_v29 = vpack.c.bf16 %v334_v26, %v327_v25  ;;  %s199_s27 = scalar_lea.vmem [#allocation2], %s847_s19 }
  0x1a   : > { %v211_v0 = vld [vmem:[%s203_s30] sm:$0xff]  ;;  %v960_v35 = vpack.c.bf16 %v348_v34, %v341_v33  ;;  %s745_s28 = sshll.u32 %s199_s27, 4  ;;  %s1287_s4 = scalar_lea.hbm %s1337_s3, %s851_s26  ;;  %s1289_s28 = int_to_ptr.vmem [resolvable:$true] %s745_s28 }
  0x1b   : > { %v213_v1 = vsel %vm212_vm0, %v211_v0, 0.0  ;;  %v217_v2 = vmul.f32 %v211_v0, %v211_v0  ;;  %s1056_s6 = scalar_lea.vmem %s1289_s28, 128  ;;  %s1139_s15 = smov [#allocation2]  }
  0x1c   : > { %214 = vadd.xlane.f32.xlu0 %v213_v1  ;;  %p1057_p12 = scmp.ne.s32.totalorder %s1289_s28, %s1056_s6  ;;  %s1060_s7 = sshll.u32 %s1139_s15, 4  ;;  %s1061_s7 = int_to_ptr.vmem [resolvable:$false] %s1060_s7 }
  0x1d   : > { %v218_v3 = vsel %vm212_vm0, %v217_v2, 0.0  ;;  %s1062_s8 = scalar_lea.vmem %s1061_s7, 256  ;;  %p1063_p1 = scmp.lt.s32.totalorder %s1289_s28, %s1061_s7 }
  0x1e   : > { %p1058_p13 = pnand %p1057_p12, %p1200_p4  ;;  %p1064_p2 = scmp.lt.s32.totalorder %s1062_s8, %s1056_s6 }
  0x20   : > { %219 = vadd.xlane.f32.xlu0 %v218_v3  ;;  %p1059_p0 = pneg %p1058_p13  ;;  %p1065_p3 = por %p1064_p2, %p1063_p1 }
  0x22   : > { %p1066_p5 = pnand %p1065_p3, %p1059_p0 }
  0xa9   : > { %v215_v38 = vpop.xlane.xlu0 %214 }
  0xaa   : > { %v216_v39 = vmul.f32 0.03125, %v215_v38 }
  0xac   : > { %v222_v41 = vmul.f32 %v216_v39, %v216_v39 }
  0xad   : > { %v220_v40 = vpop.xlane.xlu0 %219 }
  0xae   : > { %v221_v42 = vmul.f32 0.03125, %v220_v40 }
  0xb0   : > { %v223_v43 = vsub.f32 %v221_v42, %v222_v41 }
  0xb2   : > { %v224_v44 = vadd.f32 1e-05, %v223_v43 }
  0xb4   : > { %1054 = vrsqrt.f32 %v224_v44 }
  0xbe   : > { %v1055_v45 = vpop.eup %1054 }
  0xbf   : > { %v226_v46 = vmul.f32 %v1055_v45, %v211_v0  ;;  %v227_v47 = vmul.f32 %v1055_v45, %v216_v39 }
  0xc1   : > { %v228_v48 = vsub.f32 %v226_v46, %v227_v47 }
  0xc3   : > { %v241_v49 = vsel %vm212_vm0, %v228_v48, 0 }
  0xc4   : > { %v312_v50 = vand.u32 4294901760, %v241_v49 }
  0xc6   : > { %v313_v51 = vsub.f32 %v241_v49, %v312_v50 }
  0xc8   : > { %v314_v52 = vand.u32 4294901760, %v313_v51 }
  0xca   : > { %926 = vmatmul.mubr.f32.vlgmr.msra.gmra.mrb[0].mxu0 %v314_v52  ;;  %v315_v53 = vsub.f32 %v313_v51, %v314_v52 }
  0xcb   : > { %976 = vmatpush3.bf16.msra.mxu0 %v975_v22  ;;  %936 = vmatprep.mubr.msk.f32.mxu0 %vm1137_vm1, %v1138_v13 }
  0xcc   : > { %v316_v54 = vand.u32 4294901760, %v315_v53  ;;  %977 = vmatprep.subr.bf16.mxu0 %v1136_v7 }
  0xce   : > { %893 = vmatmul.mubr.f32.vlgmr.msra.gmra.mrb[0].mxu1 %v316_v54 }
  0xcf   : > { %958 = vmatpush3.bf16.msra.mxu1 %v957_v29  ;;  %979 = vmatpush3.bf16.msra.mxu0 %v978_v30 }
  0xd0   : > { %959 = vmatprep.subr.bf16.mxu1 %v1136_v7  ;;  %980 = vmatprep.subr.bf16.mxu0 %v1136_v7 }
  0xd1   : > { %903 = vmatprep.mubr.msk.f32.mxu1 %vm1137_vm1, %v1138_v13 }
  0xd2   : > { %937 = vmatmul.mubr.f32.vlgmr.msra.gmra.mrb[0].mxu0 %v312_v50 }
  0xd3   : > { %961 = vmatpush3.bf16.msra.mxu1 %v960_v35  ;;  %982 = vmatpush3.bf16.msra.mxu0 %v951_v14 }
  0xd4   : > { %962 = vmatprep.subr.bf16.mxu1 %v1136_v7  ;;  %983 = vmatprep.subr.bf16.mxu0 %v1136_v7 }
  0xd5   : > { %947 = vmatprep.mubr.msk.f32.mxu0 %vm1137_vm1, %v1138_v13 }
  0xd6   : > { %904 = vmatmul.mubr.f32.vlgmr.msra.gmra.mrb[0].mxu1 %v312_v50 }
  0xd7   : > { %964 = vmatpush3.bf16.msra.mxu1 %v963_v36  ;;  %985 = vmatpush3.bf16.msra.mxu0 %v954_v19 }
  0xd8   : > { %965 = vmatprep.subr.bf16.mxu1 %v1136_v7  ;;  %914 = vmatprep.mubr.msk.f32.mxu1 %vm1137_vm1, %v1138_v13 }
  0xda   : > { %948 = vmatmul.mubr.f32.vlgmr.msra.gmra.mrb[0].mxu0 %v312_v50 }
  0xdb   : > { %967 = vmatpush3.bf16.msra.mxu1 %v966_v37 }
  0xde   : > { %915 = vmatmul.mubr.f32.vlgmr.msra.gmra.mrb[0].mxu1 %v313_v51 }
 0x1ad   : > { %v724_v55 = vpop.f32.mrb[0].mxu0 }
 0x1ae   : > { %v949_v56 = vpop.f32.mrb[1].mxu0 }
 0x1b1   : > { %v489_v58 = vpop.f32.mrb[0].mxu1 }
 0x1b2   : > { %v986_v59 = vadd.f32 %v849_v57, %v489_v58  ;;  %v916_v60 = vpop.f32.mrb[1].mxu1 }
 0x1b4   : > { %v987_v61 = vadd.f32 %v986_v59, %v724_v55 }
 0x1b6   : > { %729 = vst.msk [vmem:[%s199_s27] sm:$0xff] %vm728_vm2, %v987_v61 }
 0x1b7   : > { %1069 = shalt.err (!%p1066_p5)
}
 0x1b8   : > { %s1070_s9 = scalar_lea.hbm %s1287_s4, 128  ;;  %s1074_s18 = scalar_lea.hbm %s1337_s3, 256 }
 0x1b9   : > { %p1071_p6 = scmp.ne.s32.totalorder %s1287_s4, %s1070_s9  ;;  %p1075_p10 = scmp.lt.u32.totalorder %s1287_s4, %s1337_s3 }
 0x1ba   : > { %p1076_p11 = scmp.lt.u32.totalorder %s1074_s18, %s1070_s9  ;;  %p1078_p13 = scmp.lt.u32.totalorder %s1070_s9, %s1287_s4 }
 0x1bb   : > { %p1072_p7 = pnand %p1071_p6, %p1200_p4 }
 0x1bc   : > { %p1077_p12 = por %p1076_p11, %p1075_p10 }
 0x1bd   : > { %p1073_p9 = pneg %p1072_p7 }
 0x1be   : > { %p1079_p0 = por %p1078_p13, %p1077_p12 }
 0x1c0   : > { %p1080_p1 = pnand %p1079_p0, %p1073_p9 }
 0x1c2   : > { %1083 = shalt.err (!%p1080_p1)
}
 0x1c3   : > { %996 = dma.vmem_to_hbm [thread:$0]  (%p1200_p4), %s1289_s28, 128, %s1287_s4, %s731_s5  }
 0x1c4 PF: > { %p1002_p2 = scmp.ge.s32.totalorder %s1134_s17, 2  ;;  %s757_s23 = sand.u32 1, %s1114_s12  }
 0x1c5   : > { %s758_s26 = scalar_lea.sflag [#allocation3], %s757_s23 }
 0x1c6   : > { %p999_p3 = pnand %p1002_p2, %p1207_p8 }
 0x1c8   : > { %1109 = dma.done.wait (!%p999_p3), %s758_s26, 128  }
 0x1c9   : > { %1111 = vsyncadd (!%p999_p3), %s758_s26, 4294967168  ;;  %s16_s17 = sadd.s32 1, %s1134_s17   ;;  %s1340_s12 = smov %s1118_s13 }
 0x1ca   : > { %p13_p5 = scmp.ge.s32.totalorder %s16_s17, 4   ;;  %s1341_s13 = smov %s1122_s14 }
 0x1cb   : > { %s1342_s14 = smov %s1213_s25  ;;  %s1343_s15 = smov %s1130_s16 }
 0x1cc   : > { %s1344_s16 = smov %s1346_s20  ;;  %15 = sbr.rel (!%p13_p5) target bundleno = 4 (0x4), region = 73 }
 0x1d3   :  { %763 = vsyncpa [#allocation3], 1 }
 0x1d4   :  { %765 = vsyncpa [#allocation3 + $0x1], 1 }

// kernel: tpu_custom_call.1
= control target key start
LH: loop header
LB: loop body
LE: loop exit
PB: predicated region body
PF: predicated region fallthrough
CT: control target
= control target key end

     0   :  { %8 = vsyncpa [#allocation3], 0  ;;  %s1334_s0 = inlined_call_operand.vmem [shape: f32[16,32], index: 0, kind: input, shape index: {}]   ;;  %s1335_s1 = inlined_call_operand.vmem [shape: f32[32,16], index: 1, kind: input, shape index: {}]   ;;  %s1336_s2 = inlined_call_operand.vmem [shape: f32[1,16], index: 2, kind: input, shape index: {}]   ;;  %s1337_s3 = inlined_call_operand.hbm [shape: f32[16,16], index: 3, kind: output, shape index: {}]  }
   0x1   :  { %10 = vsyncpa [#allocation3 + $0x1], 0  ;;  %s1160_s12 = smov 0   ;;  %s1162_s13 = smov 0  }
   0x2   :  { %s1164_s14 = smov 0   ;;  %s1166_s15 = smov 0  }
   0x3   :  { %s1168_s16 = smov 0   ;;  %s1170_s17 = smov 0  }
   0x4 LB: > { %s840_s18 = sadd.s32 4294967295, %s1134_s17   ;;  %s841_s19 = sadd.s32 4294967294, %s1134_s17   ;;  %s1134_s17 = sphi %s1170_s17, %s16_s17   ;;  %s1130_s16 = sphi %s1168_s16, %s1344_s16   ;;  %s1126_s15 = sphi %s1166_s15, %s1343_s15   ;;  %s1122_s14 = sphi %s1164_s14, %s1342_s14   ;;  %s1118_s13 = sphi %s1162_s13, %s1341_s13   ;;  %s1114_s12 = sphi %s1160_s12, %s1340_s12  }
   0x5   : > { %s25_s20 = sadd.s32 1, %s1130_s16  ;;  %s115_s21 = sadd.s32 1, %s1122_s14 }
   0x6   : > { %p26_p0 = scmp.ge.s32.totalorder %s25_s20, 2  ;;  %p125_p1 = scmp.ne.s32.totalorder %s1122_s14, %s1118_s13 }
   0x7   : > { %p126_p2 = scmp.eq.s32.totalorder %s840_s18, 1  ;;  %p131_p3 = scmp.ne.s32.totalorder %s1118_s13, %s1114_s12 }
   0x8   : > { %s1346_s20 = smov (%p26_p0, %s25_s20), 0  ;;  %p132_p5 = scmp.eq.s32.totalorder %s841_s19, 1 }
   0x9   : > { %p1200_p4 = por %p126_p2, %p125_p1  ;;  %s110_s23 = ssub.s32 %s1130_s16, %s1346_s20 }
   0xa   : > { %p846_p6 = scmp.ge.s32.totalorder %s1134_s17, 1  ;;  %p113_p7 = scmp.eq.s32.totalorder %s110_s23, 0 }
   0xb   : > { %p1207_p8 = por %p132_p5, %p131_p3  ;;  %p170_p9 = scmp.lt.s32.totalorder %s1134_s17, 3 }
   0xc   : > { %s1213_s25 = scalar_select %p113_p7, %s1122_s14, %s115_s21  }
   0xd   : > { %p171_p10 = pnand %p846_p6, %p170_p9 }
   0xe   : > { %p200_p11 = scmp.lt.s32.totalorder (!%p171_p10), %s1126_s15, 1  ;;  %vm212_vm0 = vcmask (!%p171_p10), 261120   ;;  %v229_v4 = vld [vmem:[%s1335_s1] sm:$0xff] (!%p171_p10)  ;;  %v230_v5 = vld [vmem:[%s1335_s1 + $0x8] sm:$0xff] (!%p171_p10)  ;;  %v231_v6 = vld [vmem:[%s1335_s1 + $0x10] sm:$0xff] (!%p171_p10)  ;;  %v1136_v7 = vmov (!%p171_p10), 0.0|0.0  }
   0xf   : > { %174 = sbr.rel (%p171_p10) target bundleno = 452 (0x1c4), region = 32  ;;  %968 = vmatprep.subr.bf16.mxu0 (!%p171_p10), %v1136_v7  ;;  %v244_v8 = vand.u32 (!%p171_p10), 4294901760, %v229_v4  ;;  %v247_v9 = vand.u32 (!%p171_p10), 4294901760, %v230_v5  ;;  %950 = vmatprep.subr.bf16.mxu1 (!%p171_p10), %v1136_v7  ;;  %v232_v10 = vld [vmem:[%s1335_s1 + $0x18] sm:$0xff] (!%p171_p10)  ;;  %v250_v11 = vand.u32 (!%p171_p10), 4294901760, %v231_v6  ;;  %vm1137_vm1 = vmmov (!%p171_p10), 0  }
  0x10   : > { %v253_v12 = vand.u32 (!%p171_p10), 4294901760, %v232_v10  ;;  %v1138_v13 = vmov (!%p171_p10), 0.0   ;;  %s197_s18 = sand.u32 (!%p171_p10), 1, %s1118_s13   ;;  %v849_v57 = vld [vmem:[%s1336_s2] ss:$0 sm:$0xff] (!%p171_p10)  ;;  %vm728_vm2 = vcmask (!%p171_p10), 130048  }
  0x11   : > { %925 = vmatprep.mubr.msk.f32.mxu0 (!%p171_p10), %vm1137_vm1, %v1138_v13  ;;  %892 = vmatprep.mubr.msk.f32.mxu1 (!%p171_p10), %vm1137_vm1, %v1138_v13  ;;  %v951_v14 = vpack.c.bf16 (!%p171_p10), %v247_v9, %v244_v8  ;;  %v1240_v15 = vsub.f32 (!%p171_p10), %v229_v4, %v244_v8  ;;  %v1242_v16 = vsub.f32 (!%p171_p10), %v230_v5, %v247_v9  ;;  %s847_s19 = sshll.u32 (!%p171_p10), %s197_s18, 3  ;;  %s731_s5 = scalar_lea.sflag (!%p171_p10), [#allocation3], %s197_s18 }
  0x12   : > { %v1244_v17 = vsub.f32 (!%p171_p10), %v231_v6, %v250_v11  ;;  %v1246_v18 = vsub.f32 (!%p171_p10), %v232_v10, %v253_v12  ;;  %v954_v19 = vpack.c.bf16 (!%p171_p10), %v253_v12, %v250_v11 }
  0x13   : > { %970 = vmatpush3.bf16.msra.mxu0 (!%p171_p10), %v951_v14  ;;  %952 = vmatpush3.bf16.msra.mxu1 (!%p171_p10), %v951_v14  ;;  %v325_v20 = vand.u32 (!%p171_p10), 4294901760, %v1240_v15  ;;  %v332_v21 = vand.u32 (!%p171_p10), 4294901760, %v1242_v16  ;;  %v963_v36 = vpack.c.bf16 (!%p171_p10), %v1242_v16, %v1240_v15 }
  0x14   : > { %971 = vmatprep.subr.bf16.mxu0 (!%p171_p10), %v1136_v7  ;;  %953 = vmatprep.subr.bf16.mxu1 (!%p171_p10), %v1136_v7  ;;  %v339_v27 = vand.u32 (!%p171_p10), 4294901760, %v1244_v17  ;;  %v346_v28 = vand.u32 (!%p171_p10), 4294901760, %v1246_v18  ;;  %v966_v37 = vpack.c.bf16 (!%p171_p10), %v1246_v18, %v1244_v17 }
  0x15   : > { %v975_v22 = vpack.c.bf16 (!%p171_p10), %v332_v21, %v325_v20  ;;  %v326_v23 = vsub.f32 (!%p171_p10), %v1240_v15, %v325_v20  ;;  %v333_v24 = vsub.f32 (!%p171_p10), %v1242_v16, %v332_v21 }
  0x16   : > { %s201_s26 = scalar_select %p200_p11, %s1126_s15, 1  ;;  %v978_v30 = vpack.c.bf16 %v346_v28, %v339_v27  ;;  %v340_v31 = vsub.f32 %v1244_v17, %v339_v27  ;;  %v347_v32 = vsub.f32 %v1246_v18, %v346_v28 }
  0x17   : > { %973 = vmatpush3.bf16.msra.mxu0 %v954_v19  ;;  %955 = vmatpush3.bf16.msra.mxu1 %v954_v19  ;;  %v327_v25 = vand.u32 4294901760, %v326_v23  ;;  %v334_v26 = vand.u32 4294901760, %v333_v24 }
  0x18   : > { %s848_s27 = sshll.u32 %s201_s26, 3  ;;  %974 = vmatprep.subr.bf16.mxu0 %v1136_v7  ;;  %956 = vmatprep.subr.bf16.mxu1 %v1136_v7  ;;  %v341_v33 = vand.u32 4294901760, %v340_v31  ;;  %v348_v34 = vand.u32 4294901760, %v347_v32  ;;  %s851_s26 = sshll.u32 %s1126_s15, 7 }
  0x19   : > { %s203_s30 = scalar_lea.vmem %s1334_s0, %s848_s27  ;;  %v957_v29 = vpack.c.bf16 %v334_v26, %v327_v25  ;;  %s199_s27 = scalar_lea.vmem [#allocation2], %s847_s19 }
  0x1a   : > { %v211_v0 = vld [vmem:[%s203_s30] sm:$0xff]  ;;  %v960_v35 = vpack.c.bf16 %v348_v34, %v341_v33  ;;  %s745_s28 = sshll.u32 %s199_s27, 4  ;;  %s1287_s4 = scalar_lea.hbm %s1337_s3, %s851_s26  ;;  %s1289_s28 = int_to_ptr.vmem [resolvable:$true] %s745_s28 }
  0x1b   : > { %v213_v1 = vsel %vm212_vm0, %v211_v0, 0.0  ;;  %v217_v2 = vmul.f32 %v211_v0, %v211_v0  ;;  %s1056_s6 = scalar_lea.vmem %s1289_s28, 128  ;;  %s1139_s15 = smov [#allocation2]  }
  0x1c   : > { %214 = vadd.xlane.f32.xlu0 %v213_v1  ;;  %p1057_p12 = scmp.ne.s32.totalorder %s1289_s28, %s1056_s6  ;;  %s1060_s7 = sshll.u32 %s1139_s15, 4  ;;  %s1061_s7 = int_to_ptr.vmem [resolvable:$false] %s1060_s7 }
  0x1d   : > { %v218_v3 = vsel %vm212_vm0, %v217_v2, 0.0  ;;  %s1062_s8 = scalar_lea.vmem %s1061_s7, 256  ;;  %p1063_p1 = scmp.lt.s32.totalorder %s1289_s28, %s1061_s7 }
  0x1e   : > { %p1058_p13 = pnand %p1057_p12, %p1200_p4  ;;  %p1064_p2 = scmp.lt.s32.totalorder %s1062_s8, %s1056_s6 }
  0x20   : > { %219 = vadd.xlane.f32.xlu0 %v218_v3  ;;  %p1059_p0 = pneg %p1058_p13  ;;  %p1065_p3 = por %p1064_p2, %p1063_p1 }
  0x22   : > { %p1066_p5 = pnand %p1065_p3, %p1059_p0 }
  0xa9   : > { %v215_v38 = vpop.xlane.xlu0 %214 }
  0xaa   : > { %v216_v39 = vmul.f32 0.03125, %v215_v38 }
  0xac   : > { %v222_v41 = vmul.f32 %v216_v39, %v216_v39 }
  0xad   : > { %v220_v40 = vpop.xlane.xlu0 %219 }
  0xae   : > { %v221_v42 = vmul.f32 0.03125, %v220_v40 }
  0xb0   : > { %v223_v43 = vsub.f32 %v221_v42, %v222_v41 }
  0xb2   : > { %v224_v44 = vadd.f32 1e-05, %v223_v43 }
  0xb4   : > { %1054 = vrsqrt.f32 %v224_v44 }
  0xbe   : > { %v1055_v45 = vpop.eup %1054 }
  0xbf   : > { %v226_v46 = vmul.f32 %v1055_v45, %v211_v0  ;;  %v227_v47 = vmul.f32 %v1055_v45, %v216_v39 }
  0xc1   : > { %v228_v48 = vsub.f32 %v226_v46, %v227_v47 }
  0xc3   : > { %v241_v49 = vsel %vm212_vm0, %v228_v48, 0 }
  0xc4   : > { %v312_v50 = vand.u32 4294901760, %v241_v49 }
  0xc6   : > { %v313_v51 = vsub.f32 %v241_v49, %v312_v50 }
  0xc8   : > { %v314_v52 = vand.u32 4294901760, %v313_v51 }
  0xca   : > { %926 = vmatmul.mubr.f32.vlgmr.msra.gmra.mrb[0].mxu0 %v314_v52  ;;  %v315_v53 = vsub.f32 %v313_v51, %v314_v52 }
  0xcb   : > { %976 = vmatpush3.bf16.msra.mxu0 %v975_v22  ;;  %936 = vmatprep.mubr.msk.f32.mxu0 %vm1137_vm1, %v1138_v13 }
  0xcc   : > { %v316_v54 = vand.u32 4294901760, %v315_v53  ;;  %977 = vmatprep.subr.bf16.mxu0 %v1136_v7 }
  0xce   : > { %893 = vmatmul.mubr.f32.vlgmr.msra.gmra.mrb[0].mxu1 %v316_v54 }
  0xcf   : > { %958 = vmatpush3.bf16.msra.mxu1 %v957_v29  ;;  %979 = vmatpush3.bf16.msra.mxu0 %v978_v30 }
  0xd0   : > { %959 = vmatprep.subr.bf16.mxu1 %v1136_v7  ;;  %980 = vmatprep.subr.bf16.mxu0 %v1136_v7 }
  0xd1   : > { %903 = vmatprep.mubr.msk.f32.mxu1 %vm1137_vm1, %v1138_v13 }
  0xd2   : > { %937 = vmatmul.mubr.f32.vlgmr.msra.gmra.mrb[0].mxu0 %v312_v50 }
  0xd3   : > { %961 = vmatpush3.bf16.msra.mxu1 %v960_v35  ;;  %982 = vmatpush3.bf16.msra.mxu0 %v951_v14 }
  0xd4   : > { %962 = vmatprep.subr.bf16.mxu1 %v1136_v7  ;;  %983 = vmatprep.subr.bf16.mxu0 %v1136_v7 }
  0xd5   : > { %947 = vmatprep.mubr.msk.f32.mxu0 %vm1137_vm1, %v1138_v13 }
  0xd6   : > { %904 = vmatmul.mubr.f32.vlgmr.msra.gmra.mrb[0].mxu1 %v312_v50 }
  0xd7   : > { %964 = vmatpush3.bf16.msra.mxu1 %v963_v36  ;;  %985 = vmatpush3.bf16.msra.mxu0 %v954_v19 }
  0xd8   : > { %965 = vmatprep.subr.bf16.mxu1 %v1136_v7  ;;  %914 = vmatprep.mubr.msk.f32.mxu1 %vm1137_vm1, %v1138_v13 }
  0xda   : > { %948 = vmatmul.mubr.f32.vlgmr.msra.gmra.mrb[0].mxu0 %v312_v50 }
  0xdb   : > { %967 = vmatpush3.bf16.msra.mxu1 %v966_v37 }
  0xde   : > { %915 = vmatmul.mubr.f32.vlgmr.msra.gmra.mrb[0].mxu1 %v313_v51 }
 0x1ad   : > { %v724_v55 = vpop.f32.mrb[0].mxu0 }
 0x1ae   : > { %v949_v56 = vpop.f32.mrb[1].mxu0 }
 0x1b1   : > { %v489_v58 = vpop.f32.mrb[0].mxu1 }
 0x1b2   : > { %v986_v59 = vadd.f32 %v849_v57, %v489_v58  ;;  %v916_v60 = vpop.f32.mrb[1].mxu1 }
 0x1b4   : > { %v987_v61 = vadd.f32 %v986_v59, %v724_v55 }
 0x1b6   : > { %729 = vst.msk [vmem:[%s199_s27] sm:$0xff] %vm728_vm2, %v987_v61 }
 0x1b7   : > { %1069 = shalt.err (!%p1066_p5)
}
 0x1b8   : > { %s1070_s9 = scalar_lea.hbm %s1287_s4, 128  ;;  %s1074_s18 = scalar_lea.hbm %s1337_s3, 256 }
 0x1b9   : > { %p1071_p6 = scmp.ne.s32.totalorder %s1287_s4, %s1070_s9  ;;  %p1075_p10 = scmp.lt.u32.totalorder %s1287_s4, %s1337_s3 }
 0x1ba   : > { %p1076_p11 = scmp.lt.u32.totalorder %s1074_s18, %s1070_s9  ;;  %p1078_p13 = scmp.lt.u32.totalorder %s1070_s9, %s1287_s4 }
 0x1bb   : > { %p1072_p7 = pnand %p1071_p6, %p1200_p4 }
 0x1bc   : > { %p1077_p12 = por %p1076_p11, %p1075_p10 }
 0x1bd   : > { %p1073_p9 = pneg %p1072_p7 }
 0x1be   : > { %p1079_p0 = por %p1078_p13, %p1077_p12 }
 0x1c0   : > { %p1080_p1 = pnand %p1079_p0, %p1073_p9 }
 0x1c2   : > { %1083 = shalt.err (!%p1080_p1)
}
 0x1c3   : > { %996 = dma.vmem_to_hbm [thread:$0]  (%p1200_p4), %s1289_s28, 128, %s1287_s4, %s731_s5  }
 0x1c4 PF: > { %p1002_p2 = scmp.ge.s32.totalorder %s1134_s17, 2  ;;  %s757_s23 = sand.u32 1, %s1114_s12  }
 0x1c5   : > { %s758_s26 = scalar_lea.sflag [#allocation3], %s757_s23 }
 0x1c6   : > { %p999_p3 = pnand %p1002_p2, %p1207_p8 }
 0x1c8   : > { %1109 = dma.done.wait (!%p999_p3), %s758_s26, 128  }
 0x1c9   : > { %1111 = vsyncadd (!%p999_p3), %s758_s26, 4294967168  ;;  %s16_s17 = sadd.s32 1, %s1134_s17   ;;  %s1340_s12 = smov %s1118_s13 }
 0x1ca   : > { %p13_p5 = scmp.ge.s32.totalorder %s16_s17, 4   ;;  %s1341_s13 = smov %s1122_s14 }
 0x1cb   : > { %s1342_s14 = smov %s1213_s25  ;;  %s1343_s15 = smov %s1130_s16 }
 0x1cc   : > { %s1344_s16 = smov %s1346_s20  ;;  %15 = sbr.rel (!%p13_p5) target bundleno = 4 (0x4), region = 73 }
 0x1d3   :  { %763 = vsyncpa [#allocation3], 1 }
 0x1d4   :  { %765 = vsyncpa [#allocation3 + $0x1], 1 }

</bundles_post_ra>
